<compile_context>
chip_gen: v7x
topology: tpu7x:2x2x1
jax: 0.10.0
libtpu: 0.0.40
codegen_flags: <defaults>
</compile_context>

<pallas_src>
import math
import jax
import jax.numpy as jnp
from jax.experimental import pallas as pl
from jax.experimental.pallas import tpu as pltpu

_LANES = 128


def _round_up(x, m):
    return ((x + m - 1) // m) * m


def _regressor_kernel(h_ref, w_ref, b_ref, o_ref):
    # y = h_tile @ W on the MXU with f32 accumulation.  W is the real weight
    # column zero-padded to 128 lanes so the matmul result is lane-dense.
    y = jnp.dot(h_ref[...], w_ref[...], preferred_element_type=jnp.float32)  # (tile_b, 128)
    # Batch-lane packing: transpose (XLU slot, idle in this mem-bound kernel) and
    # keep only the real output column -> one lane-dense (1, tile_b) row; add the
    # scalar bias (SMEM) in f32 and store unmasked.
    row = jnp.transpose(y)[0:1, :] + b_ref[0]                                # (1, tile_b) f32
    o_ref[...] = row[None].astype(o_ref.dtype)                               # (1, 1, tile_b)


def linear_regressor(h, w, b, *, tile_b=1024, vmem_limit_bytes=None):
    """Pallas forward of LinearRegressor: y = h @ w + b.

    h: [B, D] activations (streamed once from HBM, any float dtype).
    w: [D, 1] weight (transposed relative to PyTorch nn.Linear's [1, D]).
    b: [1]    bias.
    Returns [B, 1] in h's dtype.
    """
    B, D = h.shape
    assert w.shape == (D, 1), f"expected weight [D, 1], got {w.shape}"
    assert b.shape == (1,), f"expected bias [1], got {b.shape}"
    out_dtype = h.dtype

    # Tiny, one-off weight/bias plumbing (no pass over h).
    w_pad = jnp.zeros((D, _LANES), dtype=w.dtype).at[:, 0].set(w[:, 0])
    b32 = b.astype(jnp.float32)

    # Batch tile selection — never pad/copy h.  A tile covering the whole batch is
    # always legal (full-extent block); otherwise keep the tile sublane-aligned and
    # let the last grid step be a ragged partial block.
    tile_b = int(tile_b)
    if tile_b >= B:
        tile_b = B
    else:
        tile_b = max(8, (tile_b // 8) * 8)
    num_tiles = pl.cdiv(B, tile_b)

    # VMEM budget: double-buffered h tile + pinned weight + matmul/transpose temps.
    itm = jnp.dtype(h.dtype).itemsize
    need = (2 * tile_b * D * itm                      # h tile, double buffered
            + 2 * D * _LANES * w_pad.dtype.itemsize   # pinned weight
            + 3 * tile_b * _LANES * 4                 # y / y^T f32 temporaries
            + 2 * tile_b * 4)                         # packed output tile
    if vmem_limit_bytes is None:
        vmem_limit_bytes = max(32 << 20, _round_up(need + (4 << 20), 1 << 20))

    cost = pl.CostEstimate(
        flops=2 * B * D,
        transcendentals=0,
        bytes_accessed=(h.size * itm
                        + w_pad.size * w_pad.dtype.itemsize
                        + 4
                        + B * jnp.dtype(out_dtype).itemsize),
    )

    out = pl.pallas_call(
        _regressor_kernel,
        out_shape=jax.ShapeDtypeStruct((num_tiles, 1, tile_b), out_dtype),
        grid_spec=pl.GridSpec(
            grid=(num_tiles,),
            in_specs=[
                pl.BlockSpec((tile_b, D), lambda i: (i, 0)),         # h tile streams
                pl.BlockSpec((D, _LANES), lambda i: (0, 0)),         # weight pinned/resident
                pl.BlockSpec(memory_space=pltpu.MemorySpace.SMEM),   # bias scalar
            ],
            out_specs=pl.BlockSpec((1, 1, tile_b), lambda i: (i, 0, 0)),
        ),
        compiler_params=pltpu.CompilerParams(
            dimension_semantics=("parallel",),        # batch tiles split across TCs (v7x)
            vmem_limit_bytes=int(vmem_limit_bytes),
        ),
        cost_estimate=cost,
    )(h, w_pad, b32)

    # Lane-packed (num_tiles, 1, tile_b) -> [B, 1]; also drops any ragged-tile rows.
    return out.reshape(-1)[:B].reshape(B, 1)


def init_regressor_params(key, input_dim, dtype=jnp.float32):
    """Mirror nn.Linear(input_dim, 1) default init: U(-1/sqrt(fan_in), 1/sqrt(fan_in)).
    Weight is stored transposed as [input_dim, 1]."""
    kw, kb = jax.random.split(key)
    bound = 1.0 / math.sqrt(input_dim)
    w = jax.random.uniform(kw, (input_dim, 1), dtype, -bound, bound)
    b = jax.random.uniform(kb, (1,), dtype, -bound, bound)
    return w, b


if __name__ == "__main__":
    key = jax.random.PRNGKey(0)
    batch = 200          # 200 = 128 + 72 -> exercises the ragged last batch tile
    input_dim = 256      # small stand-in for the module default of 768

    kh, kp = jax.random.split(key)
    h = jax.random.normal(kh, (batch, input_dim), dtype=jnp.float32)
    w, b = init_regressor_params(kp, input_dim)

    # Ragged, 2-tile path (tile_b=128 only for the tiny demo; default is 1024).
    out = jax.block_until_ready(linear_regressor(h, w, b, tile_b=128))
    ref = jnp.dot(h, w, precision=jax.lax.Precision.HIGHEST) + b
    assert out.shape == (batch, 1)
    assert jnp.allclose(out, ref, atol=2e-3, rtol=2e-3), \
        float(jnp.max(jnp.abs(out - ref)))

    # Single full-extent tile path (tile_b clamps to the whole batch).
    h2 = jax.random.normal(kh, (256, input_dim), dtype=jnp.float32)
    out2 = jax.block_until_ready(linear_regressor(h2, w, b))
    ref2 = jnp.dot(h2, w, precision=jax.lax.Precision.HIGHEST) + b
    assert out2.shape == (256, 1)
    assert jnp.allclose(out2, ref2, atol=2e-3, rtol=2e-3)

    print("KERNEL_OK")
</pallas_src>

<mosaic_0001>
module attributes {stable_mosaic.version = 11 : i64} {
  func.func @_regressor_kernel(%arg0: i32, %arg1: memref<128x256xf32, #tpu.memory_space<vmem>>, %arg2: memref<256x128xf32, #tpu.memory_space<vmem>>, %arg3: memref<1xf32, #tpu.memory_space<smem>>, %arg4: memref<1x1x128xf32, #tpu.memory_space<vmem>>) attributes {dimension_semantics = [#tpu.dimension_semantics<parallel>], iteration_bounds = array<i64: 2>, scalar_prefetch = 0 : i64, scratch_operands = 0 : i64, tpu.core_type = #tpu.core_type<tc>, window_params = [{transform_indices = @transform_0, window_bounds = array<i64: 128, 256>}, {pipeline_mode = #tpu.pipeline_mode<synchronous>, transform_indices = @transform_1, window_bounds = array<i64: 256, 128>}, {transform_indices = @transform_2, window_bounds = array<i64: 1>}, {transform_indices = @transform_3, window_bounds = array<i64: 1, 1, 128>}]} {
    %c0 = arith.constant 0 : index
    %c0_0 = arith.constant 0 : index
    %0 = vector.load %arg1[%c0, %c0_0] : memref<128x256xf32, #tpu.memory_space<vmem>>, vector<128x256xf32>
    %c0_1 = arith.constant 0 : index
    %c0_2 = arith.constant 0 : index
    %1 = vector.load %arg2[%c0_1, %c0_2] : memref<256x128xf32, #tpu.memory_space<vmem>>, vector<256x128xf32>
    %cst = arith.constant dense<0.000000e+00> : vector<128x128xf32>
    %2 = tpu.matmul %0, %1, %cst {dimension_numbers = #tpu.dot_dimension_numbers<[1], [0], [0], [1], [0, 0, 1, 1], [], []>} : vector<128x256xf32>, vector<256x128xf32>, vector<128x128xf32> -> vector<128x128xf32>
    %3 = tpu.transpose %2, [1, 0] : vector<128x128xf32> -> vector<128x128xf32>
    %4 = vector.extract_strided_slice %3 {offsets = [0, 0], sizes = [1, 128], strides = [1, 1]} : vector<128x128xf32> to vector<1x128xf32>
    %c0_3 = arith.constant 0 : index
    %5 = memref.load %arg3[%c0_3] : memref<1xf32, #tpu.memory_space<smem>>
    %6 = vector.broadcast %5 : f32 to vector<1x128xf32>
    %7 = arith.addf %4, %6 : vector<1x128xf32>
    %8 = vector.shape_cast %7 : vector<1x128xf32> to vector<1x1x128xf32>
    %c0_4 = arith.constant 0 : index
    %c0_5 = arith.constant 0 : index
    %c0_6 = arith.constant 0 : index
    %9 = vector.load %arg4[%c0_4, %c0_5, %c0_6] : memref<1x1x128xf32, #tpu.memory_space<vmem>>, vector<1x1x128xf32>
    tpu.vector_store %arg4[%c0_4, %c0_5, %c0_6], %8 {strides = array<i32>} : memref<1x1x128xf32, #tpu.memory_space<vmem>>, vector<1x1x128xf32>,
    return
  }
  func.func @transform_0(%arg0: i32) -> (i32, i32) {
    %c0_i32 = arith.constant 0 : i32
    %c0_i32_0 = arith.constant 0 : i32
    return %arg0, %c0_i32 : i32, i32
  }
  func.func @transform_1(%arg0: i32) -> (i32, i32) {
    %c0_i32 = arith.constant 0 : i32
    %c0_i32_0 = arith.constant 0 : i32
    %c0_i32_1 = arith.constant 0 : i32
    return %c0_i32, %c0_i32_0 : i32, i32
  }
  func.func @transform_2(%arg0: i32) -> i32 {
    %c0_i32 = arith.constant 0 : i32
    %c0_i32_0 = arith.constant 0 : i32
    return %c0_i32 : i32
  }
  func.func @transform_3(%arg0: i32) -> (i32, i32, i32) {
    %c0_i32 = arith.constant 0 : i32
    %c0_i32_0 = arith.constant 0 : i32
    %c0_i32_1 = arith.constant 0 : i32
    return %arg0, %c0_i32, %c0_i32_0 : i32, i32, i32
  }
}

</mosaic_0001>

<bundles_post_ra>
// kernel: tpu_custom_call.1
= control target key start
LH: loop header
LB: loop body
LE: loop exit
PB: predicated region body
PF: predicated region fallthrough
CT: control target
= control target key end

     0   :  { %s1148_s0 = inlined_call_operand.hbm [shape: f32[200,256], index: 0, kind: input, shape index: {}]   ;;  %s1149_s1 = inlined_call_operand.hbm [shape: f32[256,128], index: 1, kind: input, shape index: {}]   ;;  %s1150_s2 = inlined_call_operand.<no memory space> [shape: f32[1], index: 2, kind: input, shape index: {}]   ;;  %s1151_s3 = inlined_call_operand.hbm [shape: f32[2,1,128], index: 3, kind: output, shape index: {}]  }
   0x1   :  { %8 = sst [smem:[#allocation2]] %s1150_s2 }
   0x2   :  { %9 = vsyncpa [#allocation4], 0 }
   0x3   :  { %11 = vsyncpa [#allocation4 + $0x1], 0 }
   0x4   :  { %12 = vsyncpa [#allocation7], 0 }
   0x5   :  { %13 = vsyncpa [#allocation5], 0 }
   0x6   :  { %15 = vsyncpa [#allocation5 + $0x1], 0  ;;  %s915_s14 = smov 0   ;;  %s917_s15 = smov 0  }
   0x7   :  { %s919_s16 = smov 0   ;;  %s921_s17 = smov 0  }
   0x8 LB: > { %s936_s2 = sadd.s32 4294967295, %s883_s17   ;;  %s552_s18 = sadd.s32 4294967294, %s883_s17   ;;  %s883_s17 = sphi %s921_s17, %s1172_s17   ;;  %s879_s16 = sphi %s919_s16, %s1171_s16   ;;  %s875_s15 = sphi %s917_s15, %s1170_s15   ;;  %s871_s14 = sphi %s915_s14, %s1169_s14  }
   0x9   : > { %s940_s19 = sadd.s32 1, %s883_s17   ;;  %s28_s20 = sadd.s32 1, %s879_s16 }
   0xa   : > { %s25_s21 = ssub.s32 %s883_s17, %s940_s19  ;;  %p35_p0 = scmp.ne.s32.totalorder %s879_s16, %s875_s15 }
   0xb   : > { %p26_p1 = scmp.eq.s32.totalorder %s25_s21, 0  ;;  %p36_p2 = scmp.eq.s32.totalorder %s883_s17, 0 }
   0xc   : > { %p41_p3 = scmp.ne.s32.totalorder %s875_s15, %s871_s14  ;;  %p1152_p4 = scmp.eq.s32.totalorder %s936_s2, 0 }
   0xd   : > { %s952_s22 = scalar_select %p26_p1, %s879_s16, %s28_s20  }
   0xe   : > { %p954_p5 = por %p36_p2, %p35_p0  ;;  %p960_p6 = por %p1152_p4, %p41_p3 }
   0xf   : > { %p107_p7 = scmp.eq.s32.totalorder %s936_s2, 1  ;;  %p113_p8 = scmp.eq.s32.totalorder %s552_s18, 1 }
  0x10   : > { %s1156_s23 = scalar_select %p954_p5, 1, 0 }
  0x11   : > { %s1157_s24 = scalar_select %p960_p6, 1, 0 }
  0x12   : > { %p553_p9 = scmp.ge.s32.totalorder %s883_s17, 1  ;;  %p120_p10 = scmp.lt.s32.totalorder %s883_s17, 3 }
  0x13   : > { %p967_p11 = por %p107_p7, %p35_p0  ;;  %p971_p12 = por %p113_p8, %p41_p3 }
  0x14   : > { %p975_p13 = pnand %p553_p9, %p120_p10  ;;  %s885_s28 = smov [#allocation6]  }
  0x15   : > { %s1158_s25 = scalar_select %p967_p11, 1, 0 }
  0x16   : > { %s1159_s26 = scalar_select %p971_p12, 1, 0 }
  0x17   : > { %s1160_s27 = scalar_select %p975_p13, 1, 0 }
  0x18   : > { %p709_p1 = pneg %p975_p13  ;;  %s132_s29 = sshll.u32 %s885_s28, 4  ;;  %s133_s29 = int_to_ptr.vmem [resolvable:$true] %s132_s29 }
  0x19   : > { %s757_s6 = scalar_lea.hbm %s1149_s1, 4096 }
  0x1a   : > { %p983_p2 = pnand %p709_p1, %p1152_p4  ;;  %p758_p0 = scmp.ne.s32.totalorder %s1149_s1, %s757_s6 }
  0x1b   : > { %p764_p9 = scmp.lt.u32.totalorder %s757_s6, %s1149_s1 }
  0x1c   : > { %p759_p3 = pneg %p983_p2 }
  0x1e   : > { %p760_p7 = pnand %p759_p3, %p758_p0 }
  0x20   : > { %p761_p8 = pneg %p760_p7 }
  0x22   : > { %p766_p10 = pnand %p764_p9, %p761_p8 }
  0x24   : > { %769 = shalt.err (!%p766_p10)
}
  0x25   : > { %s770_s11 = scalar_lea.vmem %s133_s29, 4096  ;;  %p778_p11 = scmp.lt.s32.totalorder %s133_s29, %s133_s29 }
  0x26   : > { %p771_p1 = scmp.ne.s32.totalorder %s133_s29, %s770_s11  ;;  %p779_p6 = scmp.lt.s32.totalorder %s770_s11, %s770_s11 }
  0x28   : > { %p773_p4 = pnand %p771_p1, %p759_p3  ;;  %p780_p13 = por %p779_p6, %p778_p11 }
  0x2a   : > { %p774_p12 = pneg %p773_p4 }
  0x2c   : > { %p781_p5 = pnand %p780_p13, %p774_p12 }
  0x2e   : > { %784 = shalt.err (!%p781_p5)
}
  0x2f   : > { %s886_s12 = smov 128   ;;  %s887_s13 = smov 8  }
  0x30   : > { %712 = dma.hbm_to_vmem [thread:$0]  (!%p983_p2), %s1149_s1, 4096, %s133_s29, [#allocation7], %s886_s12, %s886_s12, %s887_s13  }
  0x31   : > { %p555_p0 = scmp.ge.s32.totalorder %s883_s17, 2 }
  0x32   : > { %p1162_p4 = scmp.ne.s32.totalorder (!%p555_p0), %s1156_s23, 0 }
  0x33   : > { %145 = sbr.rel (%p555_p0) target bundleno = 93 (0x5d), region = 24 }
  0x3a   : > { %148 = sbr.rel (!%p1162_p4) target bundleno = 93 (0x5d), region = 28  ;;  %s149_s21 = sand.u32 (%p1162_p4), 1, %s879_s16  }
  0x3b   : > { %s557_s28 = sshll.u32 (%p1162_p4), %s883_s17, 4  ;;  %s556_s4 = sshll.u32 (%p1162_p4), %s149_s21, 8 }
  0x3c   : > { %s155_s5 = ssub.s32 (%p1162_p4), 25, %s557_s28  ;;  %s1013_s6 = scalar_lea.sflag (%p1162_p4), [#allocation4], %s149_s21 }
  0x3d   : > { %p156_p5 = scmp.lt.s32.totalorder (%p1162_p4), %s155_s5, 16  ;;  %s153_s7 = scalar_lea.vmem (%p1162_p4), [#allocation3], %s556_s4 }
  0x41   : > { %s1174_s5 = smov (!%p156_p5, %s155_s5), 16 }
  0x42   : > { %s1010_s30 = sshll.u32 %s1174_s5, 8 }
  0x43   : > { %s161_s29 = ssub.s32 4096, %s1010_s30 }
  0x44   : > { %162 = vsyncadd %s1013_s6, %s161_s29  ;;  %p560_p6 = scmp.ne.s32.totalorder %s1010_s30, 0  ;;  %s573_s23 = sshll.u32 %s883_s17, 12 }
  0x45   : > { %s1021_s10 = scalar_lea.hbm %s1148_s0, %s573_s23  ;;  %s168_s11 = sshll.u32 %s153_s7, 4  ;;  %s1023_s11 = int_to_ptr.vmem [resolvable:$true] %s168_s11 }
  0x46   : > { %s785_s12 = scalar_lea.hbm %s1021_s10, %s1010_s30  ;;  %s789_s20 = scalar_lea.hbm %s1148_s0, 6400 }
  0x47   : > { %p786_p11 = scmp.ne.s32.totalorder %s1021_s10, %s785_s12  ;;  %p790_p2 = scmp.lt.u32.totalorder %s1021_s10, %s1148_s0 }
  0x48   : > { %p791_p3 = scmp.lt.u32.totalorder %s789_s20, %s785_s12  ;;  %p793_p8 = scmp.lt.u32.totalorder %s785_s12, %s1021_s10 }
  0x49   : > { %p787_p12 = pnand %p786_p11, %p560_p6 }
  0x4a   : > { %p792_p7 = por %p791_p3, %p790_p2 }
  0x4b   : > { %p788_p13 = pneg %p787_p12 }
  0x4c   : > { %p794_p9 = por %p793_p8, %p792_p7 }
  0x4e   : > { %p795_p10 = pnand %p794_p9, %p788_p13 }
  0x50   : > { %798 = shalt.err (!%p795_p10)
}
  0x51   : > { %s799_s4 = scalar_lea.vmem %s1023_s11, %s1010_s30  ;;  %s888_s5 = smov [#allocation3]  }
  0x52   : > { %p800_p1 = scmp.ne.s32.totalorder %s1023_s11, %s799_s4  ;;  %s803_s29 = sshll.u32 %s888_s5, 4  ;;  %s804_s29 = int_to_ptr.vmem [resolvable:$false] %s803_s29 }
  0x53   : > { %s805_s7 = scalar_lea.vmem %s804_s29, 8192  ;;  %p806_p11 = scmp.lt.s32.totalorder %s1023_s11, %s804_s29 }
  0x54   : > { %p801_p4 = pnand %p800_p1, %p560_p6  ;;  %p807_p12 = scmp.lt.s32.totalorder %s805_s7, %s799_s4 }
  0x56   : > { %p802_p5 = pneg %p801_p4  ;;  %p808_p2 = por %p807_p12, %p806_p11 }
  0x58   : > { %p809_p3 = pnand %p808_p2, %p802_p5 }
  0x5a   : > { %812 = shalt.err (!%p809_p3)
}
  0x5b   : > { %s889_s23 = smov 256   ;;  %s890_s8 = smov 16  }
  0x5c   : > { %174 = dma.hbm_to_vmem [thread:$0]  (%p560_p6), %s1021_s10, %s1010_s30, %s1023_s11, %s1013_s6, %s889_s23, %s889_s23, %s890_s8  }
  0x5d PF: > { %p1163_p13 = scmp.ne.s32.totalorder %s1160_s27, 0 }
  0x5e   : > { %s1053_s9 = sand.u32 (!%p1163_p13), 1, %s875_s15   ;;  %p1164_p7 = scmp.ne.s32.totalorder (!%p1163_p13), %s1157_s24, 0 }
  0x5f   : > { %180 = sbr.rel (%p1163_p13) target bundleno = 501 (0x1f5), region = 32  ;;  %s566_s12 = sshll.u32 (!%p1163_p13), %s1053_s9, 8 }
  0x60   : > { %s183_s13 = scalar_lea.sflag (!%p1163_p13), [#allocation4], %s1053_s9  ;;  %s1057_s18 = scalar_lea.vmem (!%p1163_p13), [#allocation3], %s566_s12 }
  0x66   : > { %858 = dma.done.wait (%p1164_p7), %s183_s13, 4096  }
  0x67   : > { %860 = vsyncadd (%p1164_p7), %s183_s13, 4294963200  ;;  %p1165_p6 = scmp.eq.s32.totalorder %s936_s2, 0 }
  0x69   : > { %862 = dma.done.wait (%p1165_p6), [#allocation7], 4096   ;;  %p1166_p8 = pmov %p1165_p6 }
  0x6a   : > { %v266_v0 = vld [vmem:[#allocation6 + $0x80] sm:$0xff]  ;;  %v267_v1 = vld [vmem:[#allocation6 + $0x88] sm:$0xff]  ;;  %v268_v5 = vld [vmem:[#allocation6 + $0x90] sm:$0xff]  ;;  %s459_s24 = sld [smem:[#allocation2]]  ;;  %s568_s27 = sshll.u32 %s936_s2, 4 }
  0x6b   : > { %864 = vsyncadd (%p1166_p8), [#allocation7], 4294963200  ;;  %v250_v2 = vld [vmem:[#allocation6] sm:$0xff]  ;;  %v654_v3 = vpack.c.bf16 %v267_v1, %v266_v0  ;;  %v251_v4 = vld [vmem:[#allocation6 + $0x8] sm:$0xff]  ;;  %s211_s30 = scalar_lea.vmem [#allocation8], %s1053_s9  ;;  %s1104_s20 = scalar_lea.hbm %s1151_s3, %s568_s27 }
  0x6c   : > { %v269_v6 = vld [vmem:[#allocation6 + $0x98] sm:$0xff]  ;;  %v656_v7 = vpack.c.bf16 %v251_v4, %v250_v2  ;;  %v252_v9 = vld [vmem:[#allocation6 + $0x10] sm:$0xff]  ;;  %v270_v11 = vld [vmem:[#allocation6 + $0xa0] sm:$0xff]  ;;  %s476_s6 = sshll.u32 %s211_s30, 4  ;;  %s464_s21 = scalar_lea.sflag [#allocation5], %s1053_s9  ;;  %s1106_s6 = int_to_ptr.vmem [resolvable:$true] %s476_s6 }
  0x6d   : > { %v658_v8 = vpack.c.bf16 %v269_v6, %v268_v5  ;;  %v253_v10 = vld [vmem:[#allocation6 + $0x18] sm:$0xff]  ;;  %655 = vmatprep.subr.bf16.mxu0 %v654_v3  ;;  %v271_v12 = vld [vmem:[#allocation6 + $0xa8] sm:$0xff]  ;;  %686 = vmatprep.subr.bf16.mxu1 %v654_v3  ;;  %v254_v15 = vld [vmem:[#allocation6 + $0x20] sm:$0xff]  ;;  %s813_s28 = scalar_lea.vmem %s1106_s6, 16  ;;  %p1167_p10 = scmp.ne.s32.totalorder %s1158_s25, 0 }
  0x6e   : > { %657 = vmatpush3.bf16.msra.mxu0 %v656_v7  ;;  %v660_v13 = vpack.c.bf16 %v253_v10, %v252_v9  ;;  %694 = vmatpush3.bf16.msra.mxu1 %v656_v7  ;;  %v662_v14 = vpack.c.bf16 %v271_v12, %v270_v11  ;;  %v255_v16 = vld [vmem:[#allocation6 + $0x28] sm:$0xff]  ;;  %v272_v17 = vld [vmem:[#allocation6 + $0xb0] sm:$0xff]  ;;  %v273_v18 = vld [vmem:[#allocation6 + $0xb8] sm:$0xff]  ;;  %p814_p9 = scmp.ne.s32.totalorder %s1106_s6, %s813_s28  ;;  %s891_s2 = smov [#allocation8]  }
  0x6f   : > { %659 = vmatprep.subr.bf16.mxu0 %v658_v8  ;;  %687 = vmatprep.subr.bf16.mxu1 %v658_v8  ;;  %v664_v19 = vpack.c.bf16 %v255_v16, %v254_v15  ;;  %v666_v20 = vpack.c.bf16 %v273_v18, %v272_v17  ;;  %v256_v21 = vld [vmem:[#allocation6 + $0x30] sm:$0xff]  ;;  %v257_v22 = vld [vmem:[#allocation6 + $0x38] sm:$0xff]  ;;  %v274_v23 = vld [vmem:[#allocation6 + $0xc0] sm:$0xff]  ;;  %s817_s4 = sshll.u32 %s891_s2, 4  ;;  %s818_s4 = int_to_ptr.vmem [resolvable:$false] %s817_s4 }
  0x70   : > { %v275_v24 = vld [vmem:[#allocation6 + $0xc8] sm:$0xff]  ;;  %v668_v26 = vpack.c.bf16 %v257_v22, %v256_v21  ;;  %v258_v28 = vld [vmem:[#allocation6 + $0x40] sm:$0xff]  ;;  %v276_v30 = vld [vmem:[#allocation6 + $0xd0] sm:$0xff]  ;;  %p815_p1 = pnand %p814_p9, %p1167_p10  ;;  %s819_s5 = scalar_lea.vmem %s818_s4, 32 }
  0x71   : > { %v219_v25 = vld [vmem:[%s1057_s18 + $0x8] sm:$0xff]  ;;  %v670_v27 = vpack.c.bf16 %v275_v24, %v274_v23  ;;  %v277_v31 = vld [vmem:[#allocation6 + $0xd8] sm:$0xff]  ;;  %v260_v35 = vld [vmem:[#allocation6 + $0x50] sm:$0xff]  ;;  %p820_p5 = scmp.lt.s32.totalorder %s1106_s6, %s818_s4  ;;  %p821_p11 = scmp.lt.s32.totalorder %s819_s5, %s813_s28 }
  0x72   : > { %661 = vmatpush3.bf16.msra.mxu0 %v660_v13  ;;  %695 = vmatpush3.bf16.msra.mxu1 %v660_v13  ;;  %v259_v29 = vld [vmem:[#allocation6 + $0x48] sm:$0xff]  ;;  %v674_v34 = vpack.c.bf16 %v277_v31, %v276_v30  ;;  %v261_v36 = vld [vmem:[#allocation6 + $0x58] sm:$0xff]  ;;  %v278_v37 = vld [vmem:[#allocation6 + $0xe0] sm:$0xff]  ;;  %p816_p4 = pneg %p815_p1 }
  0x73   : > { %663 = vmatprep.subr.bf16.mxu0 %v662_v14  ;;  %688 = vmatprep.subr.bf16.mxu1 %v662_v14  ;;  %v672_v32 = vpack.c.bf16 %v259_v29, %v258_v28  ;;  %v235_v33 = vld [vmem:[%s1057_s18 + $0x88] sm:$0xff]  ;;  %v676_v39 = vpack.c.bf16 %v261_v36, %v260_v35  ;;  %v262_v41 = vld [vmem:[#allocation6 + $0x60] sm:$0xff]  ;;  %v280_v43 = vld [vmem:[#allocation6 + $0xf0] sm:$0xff]  ;;  %p822_p12 = por %p821_p11, %p820_p5 }
  0x74   : > { %346 = vmatprep.mubr.f32.mxu0 %v219_v25  ;;  %v279_v38 = vld [vmem:[#allocation6 + $0xe8] sm:$0xff]  ;;  %386 = vmatprep.mubr.f32.mxu1 %v235_v33  ;;  %v281_v44 = vld [vmem:[#allocation6 + $0xf8] sm:$0xff]  ;;  %v264_v47 = vld [vmem:[#allocation6 + $0x70] sm:$0xff] }
  0x75   : > { %v678_v40 = vpack.c.bf16 %v279_v38, %v278_v37  ;;  %v263_v42 = vld [vmem:[#allocation6 + $0x68] sm:$0xff]  ;;  %v682_v46 = vpack.c.bf16 %v281_v44, %v280_v43  ;;  %v265_v48 = vld [vmem:[#allocation6 + $0x78] sm:$0xff]  ;;  %v218_v50 = vld [vmem:[%s1057_s18] sm:$0xff]  ;;  %p823_p2 = pnand %p822_p12, %p816_p4 }
  0x76   : > { %665 = vmatpush3.bf16.msra.mxu0 %v664_v19  ;;  %696 = vmatpush3.bf16.msra.mxu1 %v664_v19  ;;  %v680_v45 = vpack.c.bf16 %v263_v42, %v262_v41  ;;  %v684_v49 = vpack.c.bf16 %v265_v48, %v264_v47  ;;  %v234_v51 = vld [vmem:[%s1057_s18 + $0x80] sm:$0xff]  ;;  %v221_v52 = vld [vmem:[%s1057_s18 + $0x18] sm:$0xff]  ;;  %v220_v54 = vld [vmem:[%s1057_s18 + $0x10] sm:$0xff] }
  0x77   : > { %667 = vmatprep.subr.bf16.mxu0 %v666_v20  ;;  %689 = vmatprep.subr.bf16.mxu1 %v666_v20  ;;  %v237_v53 = vld [vmem:[%s1057_s18 + $0x98] sm:$0xff]  ;;  %v236_v55 = vld [vmem:[%s1057_s18 + $0x90] sm:$0xff]  ;;  %v223_v56 = vld [vmem:[%s1057_s18 + $0x28] sm:$0xff] }
  0x78   : > { %v239_v57 = vld [vmem:[%s1057_s18 + $0xa8] sm:$0xff]  ;;  %v222_v58 = vld [vmem:[%s1057_s18 + $0x20] sm:$0xff]  ;;  %v225_v60 = vld [vmem:[%s1057_s18 + $0x38] sm:$0xff] }
  0x79   : > { %v238_v59 = vld [vmem:[%s1057_s18 + $0xa0] sm:$0xff]  ;;  %v241_v61 = vld [vmem:[%s1057_s18 + $0xb8] sm:$0xff]  ;;  %v224_v62 = vld [vmem:[%s1057_s18 + $0x30] sm:$0xff] }
  0x7a   : > { %669 = vmatpush3.bf16.msra.mxu0 %v668_v26  ;;  %697 = vmatpush3.bf16.msra.mxu1 %v668_v26  ;;  %v240_v63 = vld [vmem:[%s1057_s18 + $0xb0] sm:$0xff]  ;;  %v227_v0 = vld [vmem:[%s1057_s18 + $0x48] sm:$0xff]  ;;  %v226_v2 = vld [vmem:[%s1057_s18 + $0x40] sm:$0xff] }
  0x7b   : > { %671 = vmatprep.subr.bf16.mxu0 %v670_v27  ;;  %690 = vmatprep.subr.bf16.mxu1 %v670_v27  ;;  %v243_v1 = vld [vmem:[%s1057_s18 + $0xc8] sm:$0xff]  ;;  %v242_v3 = vld [vmem:[%s1057_s18 + $0xc0] sm:$0xff]  ;;  %v229_v4 = vld [vmem:[%s1057_s18 + $0x58] sm:$0xff] }
  0x7c   : > { %v245_v5 = vld [vmem:[%s1057_s18 + $0xd8] sm:$0xff]  ;;  %v228_v6 = vld [vmem:[%s1057_s18 + $0x50] sm:$0xff]  ;;  %v231_v8 = vld [vmem:[%s1057_s18 + $0x68] sm:$0xff] }
  0x7d   : > { %v244_v7 = vld [vmem:[%s1057_s18 + $0xd0] sm:$0xff]  ;;  %v247_v9 = vld [vmem:[%s1057_s18 + $0xe8] sm:$0xff]  ;;  %v230_v10 = vld [vmem:[%s1057_s18 + $0x60] sm:$0xff] }
  0x7e   : > { %673 = vmatpush3.bf16.msra.mxu0 %v672_v32  ;;  %698 = vmatpush3.bf16.msra.mxu1 %v672_v32  ;;  %v246_v11 = vld [vmem:[%s1057_s18 + $0xe0] sm:$0xff]  ;;  %v233_v12 = vld [vmem:[%s1057_s18 + $0x78] sm:$0xff]  ;;  %v232_v14 = vld [vmem:[%s1057_s18 + $0x70] sm:$0xff] }
  0x7f   : > { %675 = vmatprep.subr.bf16.mxu0 %v674_v34  ;;  %691 = vmatprep.subr.bf16.mxu1 %v674_v34  ;;  %v249_v13 = vld [vmem:[%s1057_s18 + $0xf8] sm:$0xff]  ;;  %v248_v15 = vld [vmem:[%s1057_s18 + $0xf0] sm:$0xff] }
  0x82   : > { %677 = vmatpush3.bf16.msra.mxu0 %v676_v39  ;;  %699 = vmatpush3.bf16.msra.mxu1 %v676_v39 }
  0x83   : > { %679 = vmatprep.subr.bf16.mxu0 %v678_v40  ;;  %692 = vmatprep.subr.bf16.mxu1 %v678_v40 }
  0x86   : > { %681 = vmatpush3.bf16.msra.mxu0 %v680_v45  ;;  %700 = vmatpush3.bf16.msra.mxu1 %v680_v45 }
  0x87   : > { %683 = vmatprep.subr.bf16.mxu0 %v682_v46  ;;  %693 = vmatprep.subr.bf16.mxu1 %v682_v46 }
  0x8a   : > { %685 = vmatpush3.bf16.msra.mxu0 %v684_v49  ;;  %701 = vmatpush3.bf16.msra.mxu1 %v684_v49 }
  0x8d   : > { %347 = vmatmul.mubr.f32.vlgmr.msra.gmra.mrb[0].mxu0 %v218_v50  ;;  %387 = vmatmul.mubr.f32.vlgmr.msra.gmra.mrb[0].mxu1 %v234_v51 }
  0x8e   : > { %351 = vmatprep.mubr.f32.mxu0 %v221_v52  ;;  %391 = vmatprep.mubr.f32.mxu1 %v237_v53 }
  0x91   : > { %352 = vmatmul.mubr.f32.gmra.mrb[2].mxu0 %v220_v54  ;;  %392 = vmatmul.mubr.f32.gmra.mrb[2].mxu1 %v236_v55 }
  0x92   : > { %356 = vmatprep.mubr.f32.mxu0 %v223_v56  ;;  %396 = vmatprep.mubr.f32.mxu1 %v239_v57 }
  0x95   : > { %357 = vmatmul.mubr.f32.gmra.mrb[4].mxu0 %v222_v58  ;;  %397 = vmatmul.mubr.f32.gmra.mrb[4].mxu1 %v238_v59 }
  0x96   : > { %361 = vmatprep.mubr.f32.mxu0 %v225_v60  ;;  %401 = vmatprep.mubr.f32.mxu1 %v241_v61 }
  0x99   : > { %362 = vmatmul.mubr.f32.gmra.mrb[6].mxu0 %v224_v62  ;;  %402 = vmatmul.mubr.f32.gmra.mrb[6].mxu1 %v240_v63 }
  0x9a   : > { %366 = vmatprep.mubr.f32.mxu0 %v227_v0  ;;  %406 = vmatprep.mubr.f32.mxu1 %v243_v1  ;;  %v460_v0 = vstv %s459_s24 }
  0x9d   : > { %367 = vmatmul.mubr.f32.gmra.mrb[8].mxu0 %v226_v2  ;;  %407 = vmatmul.mubr.f32.gmra.mrb[8].mxu1 %v242_v3 }
  0x9e   : > { %371 = vmatprep.mubr.f32.mxu0 %v229_v4  ;;  %411 = vmatprep.mubr.f32.mxu1 %v245_v5 }
  0xa1   : > { %372 = vmatmul.mubr.f32.gmra.mrb[10].mxu0 %v228_v6  ;;  %412 = vmatmul.mubr.f32.gmra.mrb[10].mxu1 %v244_v7 }
  0xa2   : > { %376 = vmatprep.mubr.f32.mxu0 %v231_v8  ;;  %416 = vmatprep.mubr.f32.mxu1 %v247_v9 }
  0xa5   : > { %377 = vmatmul.mubr.f32.gmra.mrb[12].mxu0 %v230_v10  ;;  %417 = vmatmul.mubr.f32.gmra.mrb[12].mxu1 %v246_v11 }
  0xa6   : > { %381 = vmatprep.mubr.f32.mxu0 %v233_v12  ;;  %421 = vmatprep.mubr.f32.mxu1 %v249_v13 }
  0xa9   : > { %382 = vmatmul.mubr.f32.gmra.mrb[14].mxu0 %v232_v14  ;;  %422 = vmatmul.mubr.f32.gmra.mrb[14].mxu1 %v248_v15 }
 0x160   : > { %v606_v16 = vpop.f32.mrb[0].mxu0  ;;  %v630_v17 = vpop.f32.mrb[0].mxu1 }
 0x161   : > { %v607_v18 = vpop.f32.mrb[1].mxu0  ;;  %v631_v19 = vpop.f32.mrb[1].mxu1 }
 0x162   : > { %v608_v20 = vadd.f32 %v607_v18, %v606_v16  ;;  %v632_v21 = vadd.f32 %v631_v19, %v630_v17 }
 0x164   : > { %v609_v22 = vpop.f32.mrb[2].mxu0  ;;  %427 = vxpose.xlu0.b32.start [1/16] (narrow) %v608_v20, 8  ;;  %v633_v23 = vpop.f32.mrb[2].mxu1 }
 0x165   : > { %v610_v24 = vpop.f32.mrb[3].mxu0  ;;  %v634_v25 = vpop.f32.mrb[3].mxu1 }
 0x166   : > { %v611_v26 = vadd.f32 %v610_v24, %v609_v22  ;;  %v635_v27 = vadd.f32 %v634_v25, %v633_v23 }
 0x168   : > { %v612_v28 = vpop.f32.mrb[4].mxu0  ;;  %428 = vxpose.xlu0.b32.cont [2/16] (narrow) %v611_v26, 8  ;;  %v636_v29 = vpop.f32.mrb[4].mxu1 }
 0x169   : > { %v613_v30 = vpop.f32.mrb[5].mxu0  ;;  %v637_v31 = vpop.f32.mrb[5].mxu1 }
 0x16a   : > { %v614_v32 = vadd.f32 %v613_v30, %v612_v28  ;;  %v638_v33 = vadd.f32 %v637_v31, %v636_v29 }
 0x16c   : > { %v615_v34 = vpop.f32.mrb[6].mxu0  ;;  %429 = vxpose.xlu0.b32.cont [3/16] (narrow) %v614_v32, 8  ;;  %v639_v35 = vpop.f32.mrb[6].mxu1 }
 0x16d   : > { %v616_v36 = vpop.f32.mrb[7].mxu0  ;;  %v640_v37 = vpop.f32.mrb[7].mxu1 }
 0x16e   : > { %v617_v38 = vadd.f32 %v616_v36, %v615_v34  ;;  %v641_v39 = vadd.f32 %v640_v37, %v639_v35 }
 0x170   : > { %v618_v40 = vpop.f32.mrb[8].mxu0  ;;  %430 = vxpose.xlu0.b32.cont [4/16] (narrow) %v617_v38, 8  ;;  %v642_v41 = vpop.f32.mrb[8].mxu1 }
 0x171   : > { %v619_v42 = vpop.f32.mrb[9].mxu0  ;;  %v643_v43 = vpop.f32.mrb[9].mxu1 }
 0x172   : > { %v620_v44 = vadd.f32 %v619_v42, %v618_v40  ;;  %v644_v45 = vadd.f32 %v643_v43, %v642_v41 }
 0x174   : > { %v621_v46 = vpop.f32.mrb[10].mxu0  ;;  %431 = vxpose.xlu0.b32.cont [5/16] (narrow) %v620_v44, 8  ;;  %v645_v47 = vpop.f32.mrb[10].mxu1 }
 0x175   : > { %v622_v48 = vpop.f32.mrb[11].mxu0  ;;  %v646_v49 = vpop.f32.mrb[11].mxu1 }
 0x176   : > { %v623_v50 = vadd.f32 %v622_v48, %v621_v46  ;;  %v647_v51 = vadd.f32 %v646_v49, %v645_v47 }
 0x178   : > { %v624_v52 = vpop.f32.mrb[12].mxu0  ;;  %432 = vxpose.xlu0.b32.cont [6/16] (narrow) %v623_v50, 8  ;;  %v648_v53 = vpop.f32.mrb[12].mxu1 }
 0x179   : > { %v625_v54 = vpop.f32.mrb[13].mxu0  ;;  %v649_v55 = vpop.f32.mrb[13].mxu1 }
 0x17a   : > { %v626_v56 = vadd.f32 %v625_v54, %v624_v52  ;;  %v650_v57 = vadd.f32 %v649_v55, %v648_v53 }
 0x17c   : > { %v627_v58 = vpop.f32.mrb[14].mxu0  ;;  %433 = vxpose.xlu0.b32.cont [7/16] (narrow) %v626_v56, 8  ;;  %v651_v59 = vpop.f32.mrb[14].mxu1 }
 0x17d   : > { %v628_v60 = vpop.f32.mrb[15].mxu0  ;;  %v652_v61 = vpop.f32.mrb[15].mxu1 }
 0x17e   : > { %v629_v62 = vadd.f32 %v628_v60, %v627_v58  ;;  %v653_v63 = vadd.f32 %v652_v61, %v651_v59 }
 0x180   : > { %434 = vxpose.xlu0.b32.cont [8/16] (narrow) %v629_v62, 8 }
 0x184   : > { %435 = vxpose.xlu0.b32.cont [9/16] (narrow) %v632_v21, 8 }
 0x188   : > { %436 = vxpose.xlu0.b32.cont [10/16] (narrow) %v635_v27, 8 }
 0x18c   : > { %437 = vxpose.xlu0.b32.cont [11/16] (narrow) %v638_v33, 8 }
 0x190   : > { %438 = vxpose.xlu0.b32.cont [12/16] (narrow) %v641_v39, 8 }
 0x194   : > { %439 = vxpose.xlu0.b32.cont [13/16] (narrow) %v644_v45, 8 }
 0x198   : > { %440 = vxpose.xlu0.b32.cont [14/16] (narrow) %v647_v51, 8 }
 0x19c   : > { %441 = vxpose.xlu0.b32.cont [15/16] (narrow) %v650_v57, 8 }
 0x1a0   : > { %442 = vxpose.xlu0.b32.end [16/16] (narrow) %v653_v63, 8 }
 0x1e4   : > { %v443_v1 = vpop.trf.xlu0 }
 0x1e5   : > { %v461_v2 = vadd.f32 %v460_v0, %v443_v1 }
 0x1e7   : > { %462 = vst [vmem:[%s211_s30] sm:$0x1] %v461_v2 }
 0x1e8   : > { %826 = shalt.err (!%p823_p2)
}
 0x1e9   : > { %s827_s29 = scalar_lea.hbm %s1104_s20, 16  ;;  %s831_s8 = scalar_lea.hbm %s1151_s3, 32 }
 0x1ea   : > { %p828_p3 = scmp.ne.s32.totalorder %s1104_s20, %s827_s29  ;;  %p832_p6 = scmp.lt.u32.totalorder %s1104_s20, %s1151_s3 }
 0x1eb   : > { %p833_p8 = scmp.lt.u32.totalorder %s831_s8, %s827_s29  ;;  %p835_p1 = scmp.lt.u32.totalorder %s827_s29, %s1104_s20 }
 0x1ec   : > { %p829_p13 = pnand %p828_p3, %p1167_p10 }
 0x1ed   : > { %p834_p9 = por %p833_p8, %p832_p6 }
 0x1ee   : > { %p830_p7 = pneg %p829_p13 }
 0x1ef   : > { %p836_p4 = por %p835_p1, %p834_p9 }
 0x1f1   : > { %p837_p5 = pnand %p836_p4, %p830_p7 }
 0x1f3   : > { %840 = shalt.err (!%p837_p5)
}
 0x1f4   : > { %707 = dma.vmem_to_hbm [thread:$0]  (%p1167_p10), %s1106_s6, 16, %s1104_s20, %s464_s21  }
 0x1f5 PF: > { %s488_s13 = sand.u32 1, %s871_s14   ;;  %p1168_p11 = scmp.ne.s32.totalorder %s1159_s26, 0 }
 0x1f6   : > { %s489_s18 = scalar_lea.sflag [#allocation5], %s488_s13 }
 0x1f7   : > { %p714_p12 = pnand %p555_p0, %p1168_p11 }
 0x1f9   : > { %866 = dma.done.wait (!%p714_p12), %s489_s18, 16  }
 0x1fa   : > { %868 = vsyncadd (!%p714_p12), %s489_s18, 4294967280  ;;  %p18_p2 = scmp.ge.s32.totalorder %s940_s19, 4   ;;  %s1169_s14 = smov %s875_s15 }
 0x1fb   : > { %s1170_s15 = smov %s879_s16  ;;  %s1171_s16 = smov %s952_s22 }
 0x1fc   : > { %s1172_s17 = smov %s940_s19  ;;  %20 = sbr.rel (!%p18_p2) target bundleno = 8 (0x8), region = 81 }
 0x203   :  { %493 = vsyncpa [#allocation4], 1 }
 0x204   :  { %495 = vsyncpa [#allocation4 + $0x1], 1 }
 0x205   :  { %496 = vsyncpa [#allocation7], 1 }
 0x206   :  { %497 = vsyncpa [#allocation5], 1 }
 0x207   :  { %499 = vsyncpa [#allocation5 + $0x1], 1 }

</bundles_post_ra>
